<compile_context>
chip_gen: v7x
topology: tpu7x:2x2x1
jax: 0.10.0
libtpu: 0.0.40
codegen_flags: <defaults>
</compile_context>

<pallas_src>
import jax
import jax.numpy as jnp
from jax import lax
from jax.experimental import pallas as pl
from jax.experimental.pallas import tpu as pltpu

LANE = 128
SUBLANE = 8


def _round_up(v: int, m: int) -> int:
    return (v + m - 1) // m * m


def actor_critic_forward(x, params, *, tile_b: int = 512,
                         single_pass_max_rows: int = 1024,
                         compute_dtype=jnp.bfloat16):
    """Forward pass of the (non-CNN, non-PPO) ActorCritic module.

    x:      (B, D_obs) float32 observations (already flattened).
    params: (w1, b1, w2, b2, wa, ba, wc, bc); weights stored (in, out), biases (1, out).
    Returns (B, A) float32: critic(h) + (actor(h) - actor(h).mean())  [global mean].
    """
    w1, b1, w2, b2, wa, ba, wc, bc = params
    B, D = x.shape
    H1 = w1.shape[1]
    H2 = w2.shape[1]
    A = wa.shape[1]

    OUT_W = _round_up(A + 1, SUBLANE)   # output width: A adv cols + value col, padded to 8
    HP = _round_up(A + 1, LANE)         # lane-dense fused-head matmul width (128)

    # ---- host-side prep -------------------------------------------------------
    # Fused dueling head: one (H2, 128) matmul; cols [0,A)=adv, col A=value, rest zero.
    wh = jnp.pad(jnp.concatenate([wa, wc], axis=1), ((0, 0), (0, HP - (A + 1))))
    bh = jnp.pad(jnp.concatenate([ba, bc], axis=1), ((0, 0), (0, HP - (A + 1))))

    # bf16 operands (default) halve activation/weight DMA bytes and use the bf16
    # MXU path; accumulation is f32 and biases / ReLU / mean stay f32 (OK on v5e).
    cdt = jnp.dtype(compute_dtype)
    w1_c, w2_c, wh_c = (w.astype(cdt) for w in (w1, w2, wh))
    b1_f, b2_f, bh_f = (b.astype(jnp.float32) for b in (b1, b2, bh))

    inv_count = 1.0 / float(B * A)
    adv_cols = (jnp.arange(HP) < A).astype(jnp.float32)[None, :]   # (1, HP) adv-column mask

    def wspec(shape):
        return pl.BlockSpec(shape, lambda i: (0, 0))   # resident in VMEM (constant block)

    weight_specs = [wspec((D, H1)), wspec((1, H1)),
                    wspec((H1, H2)), wspec((1, H2)),
                    wspec((H2, HP)), wspec((1, HP))]

    def trunk_head(x_ref, w1_ref, b1_ref, w2_ref, b2_ref, wh_ref, bh_ref):
        h1 = jnp.dot(x_ref[...], w1_ref[...],
                     preferred_element_type=jnp.float32) + b1_ref[...]
        h1 = jnp.maximum(h1, 0.0)
        h2 = jnp.dot(h1.astype(cdt), w2_ref[...],
                     preferred_element_type=jnp.float32) + b2_ref[...]
        h2 = jnp.maximum(h2, 0.0)
        return jnp.dot(h2.astype(cdt), wh_ref[...],
                       preferred_element_type=jnp.float32) + bh_ref[...]

    B_pad8 = _round_up(max(B, 1), SUBLANE)

    # ---------------- single-pass fast path (batch fits one tile) --------------
    if B_pad8 <= single_pass_max_rows:
        TB = B_pad8
        x_c = jnp.pad(x, ((0, TB - B), (0, 0))).astype(cdt)

        def single_kernel(x_ref, w1_ref, b1_ref, w2_ref, b2_ref, wh_ref, bh_ref,
                          out_ref):
            head = trunk_head(x_ref, w1_ref, b1_ref, w2_ref, b2_ref, wh_ref, bh_ref)
            col = lax.broadcasted_iota(jnp.int32, head.shape, 1)
            row = lax.broadcasted_iota(jnp.int32, head.shape, 0)
            masked = jnp.where(jnp.logical_and(col < A, row < B), head, 0.0)
            # rows first (sublane reduce), then one cross-lane reduce -> (1, 1)
            mean = jnp.sum(jnp.sum(masked, axis=0, keepdims=True),
                           axis=1, keepdims=True) * inv_count
            val = head[:, A:A + 1]                       # critic column, (TB, 1)
            # cols >= A contain garbage and are sliced off by the wrapper.
            out_ref[...] = (head[:, :OUT_W] + val) - mean

        out_pad = pl.pallas_call(
            single_kernel,
            out_shape=jax.ShapeDtypeStruct((TB, OUT_W), jnp.float32),
            grid=(1,),
            in_specs=[pl.BlockSpec((TB, D), lambda i: (0, 0))] + weight_specs,
            out_specs=pl.BlockSpec((TB, OUT_W), lambda i: (0, 0)),
            compiler_params=pltpu.CompilerParams(
                dimension_semantics=("arbitrary",)),
        )(x_c, w1_c, b1_f, w2_c, b2_f, wh_c, bh_f)
        return out_pad[:B, :A]

    # ---------------- multi-tile path: two pallas_calls, parallel batch axis ---
    TB = _round_up(min(tile_b, B_pad8), SUBLANE)
    B_pad = _round_up(B, TB)
    n_tiles = B_pad // TB
    x_c = jnp.pad(x, ((0, B_pad - B), (0, 0))).astype(cdt)

    # Call A: per-tile, per-lane partial sums of the masked advantages.
    # Output is tiny ((n_tiles, 1, 128) f32) — no full-size output write here.
    def sum_kernel(x_ref, w1_ref, b1_ref, w2_ref, b2_ref, wh_ref, bh_ref,
                   psum_ref):
        t = pl.program_id(0)
        head = trunk_head(x_ref, w1_ref, b1_ref, w2_ref, b2_ref, wh_ref, bh_ref)
        col = lax.broadcasted_iota(jnp.int32, head.shape, 1)
        row = lax.broadcasted_iota(jnp.int32, head.shape, 0) + t * TB
        masked = jnp.where(jnp.logical_and(col < A, row < B), head, 0.0)
        psum_ref[0] = jnp.sum(masked, axis=0, keepdims=True)        # (1, HP) lane vector

    psums = pl.pallas_call(
        sum_kernel,
        out_shape=jax.ShapeDtypeStruct((n_tiles, 1, HP), jnp.float32),
        grid=(n_tiles,),
        in_specs=[pl.BlockSpec((TB, D), lambda t: (t, 0))] + weight_specs,
        out_specs=pl.BlockSpec((1, 1, HP), lambda t: (t, 0, 0)),
        compiler_params=pltpu.CompilerParams(
            dimension_semantics=("parallel",)),
    )(x_c, w1_c, b1_f, w2_c, b2_f, wh_c, bh_f)

    # Tiny XLA reduce for the global mean; fold "- mean" into the advantage
    # columns of the head bias so call B needs no extra input and no masking.
    mean = jnp.sum(psums) * inv_count
    bh_centered = bh_f - mean * adv_cols

    # Call B: recompute the cheap trunk and write the centered output exactly once.
    def write_kernel(x_ref, w1_ref, b1_ref, w2_ref, b2_ref, wh_ref, bhm_ref,
                     out_ref):
        head = trunk_head(x_ref, w1_ref, b1_ref, w2_ref, b2_ref, wh_ref, bhm_ref)
        val = head[:, A:A + 1]                           # critic column (bias NOT shifted)
        out_ref[...] = head[:, :OUT_W] + val             # adv cols already have -mean

    out_pad = pl.pallas_call(
        write_kernel,
        out_shape=jax.ShapeDtypeStruct((B_pad, OUT_W), jnp.float32),
        grid=(n_tiles,),
        in_specs=[pl.BlockSpec((TB, D), lambda t: (t, 0))] + weight_specs,
        out_specs=pl.BlockSpec((TB, OUT_W), lambda t: (t, 0)),
        compiler_params=pltpu.CompilerParams(
            dimension_semantics=("parallel",)),
    )(x_c, w1_c, b1_f, w2_c, b2_f, wh_c, bh_centered)

    return out_pad[:B, :A]


def init_params(key, d_obs, h1, h2, n_actions):
    """Deterministic synthetic init (kaiming-normal for ReLU layers, uniform biases)."""
    ks = jax.random.split(key, 8)

    def kaiming(k, fan_in, fan_out):
        return (jax.random.normal(k, (fan_in, fan_out), jnp.float32)
                * jnp.sqrt(2.0 / fan_in))

    def bias(k, fan_in, fan_out):
        bound = 1.0 / jnp.sqrt(fan_in)
        return jax.random.uniform(k, (1, fan_out), jnp.float32, -bound, bound)

    w1 = kaiming(ks[0], d_obs, h1); b1 = bias(ks[1], d_obs, h1)
    w2 = kaiming(ks[2], h1, h2);    b2 = bias(ks[3], h1, h2)
    wa = kaiming(ks[4], h2, n_actions); ba = bias(ks[5], h2, n_actions)
    wc = kaiming(ks[6], h2, 1);         bc = bias(ks[7], h2, 1)
    return (w1, b1, w2, b2, wa, ba, wc, bc)


def reference_forward(x, params):
    w1, b1, w2, b2, wa, ba, wc, bc = params
    h1 = jnp.maximum(x @ w1 + b1, 0.0)
    h2 = jnp.maximum(h1 @ w2 + b2, 0.0)
    adv = h2 @ wa + ba
    val = h2 @ wc + bc
    return val + (adv - jnp.mean(adv))


if __name__ == "__main__":
    # Shapes consistent with the module: size_ob=(16,) -> prod 16, l1 out = 64,
    # HIDDEN_SIZE_2 = 32, size_action = 6.
    D_OBS, H1, H2, A = 16, 64, 32, 6

    key = jax.random.PRNGKey(0)
    k_x, k_x2, k_p = jax.random.split(key, 3)
    params = init_params(k_p, D_OBS, H1, H2, A)

    # 1) small batch, f32 operands, single-pass fast path.
    x_small = jax.random.normal(k_x, (8, D_OBS), jnp.float32)
    out = jax.block_until_ready(
        actor_critic_forward(x_small, params, compute_dtype=jnp.float32))
    ref = reference_forward(x_small, params)
    assert out.shape == (8, A)
    assert jnp.allclose(out, ref, atol=5e-3, rtol=5e-3), "f32 mismatch (single-pass)"

    # 2) ragged batch, f32 operands, forced multi-tile two-call path (3 tiles of 128):
    #    exercises the partial-sum kernel, the XLA mean fold, and pad-row masking.
    x_big = jax.random.normal(k_x2, (300, D_OBS), jnp.float32)
    out_big = jax.block_until_ready(
        actor_critic_forward(x_big, params, tile_b=128, single_pass_max_rows=0,
                             compute_dtype=jnp.float32))
    ref_big = reference_forward(x_big, params)
    assert out_big.shape == (300, A)
    assert jnp.allclose(out_big, ref_big, atol=5e-3, rtol=5e-3), "f32 mismatch (two-call path)"

    # 3) default config (bf16 MXU operands, single-pass path); loose sanity tolerance.
    out_bf16 = jax.block_until_ready(actor_critic_forward(x_big, params))
    assert out_bf16.shape == (300, A)
    assert bool(jnp.all(jnp.isfinite(out_bf16)))
    assert jnp.allclose(out_bf16, ref_big, atol=0.5, rtol=0.25), "bf16 sanity (single-pass)"

    # 4) default bf16 operands on the multi-tile two-call path as well.
    out_bf16_mt = jax.block_until_ready(
        actor_critic_forward(x_big, params, tile_b=128, single_pass_max_rows=0))
    assert out_bf16_mt.shape == (300, A)
    assert jnp.allclose(out_bf16_mt, ref_big, atol=0.5, rtol=0.25), "bf16 sanity (two-call path)"

    print("KERNEL_OK")
</pallas_src>

<mosaic_0001>
module attributes {stable_mosaic.version = 11 : i64} {
  func.func @single_kernel(%arg0: i32, %arg1: memref<8x16xf32, #tpu.memory_space<vmem>>, %arg2: memref<16x64xf32, #tpu.memory_space<vmem>>, %arg3: memref<1x64xf32, #tpu.memory_space<vmem>>, %arg4: memref<64x32xf32, #tpu.memory_space<vmem>>, %arg5: memref<1x32xf32, #tpu.memory_space<vmem>>, %arg6: memref<32x128xf32, #tpu.memory_space<vmem>>, %arg7: memref<1x128xf32, #tpu.memory_space<vmem>>, %arg8: memref<8x8xf32, #tpu.memory_space<vmem>>) attributes {dimension_semantics = [#tpu.dimension_semantics<arbitrary>], iteration_bounds = array<i64: 1>, scalar_prefetch = 0 : i64, scratch_operands = 0 : i64, tpu.core_type = #tpu.core_type<tc>, window_params = [{pipeline_mode = #tpu.pipeline_mode<synchronous>, transform_indices = @transform_0, window_bounds = array<i64: 8, 16>}, {pipeline_mode = #tpu.pipeline_mode<synchronous>, transform_indices = @transform_1, window_bounds = array<i64: 16, 64>}, {pipeline_mode = #tpu.pipeline_mode<synchronous>, transform_indices = @transform_2, window_bounds = array<i64: 1, 64>}, {pipeline_mode = #tpu.pipeline_mode<synchronous>, transform_indices = @transform_3, window_bounds = array<i64: 64, 32>}, {pipeline_mode = #tpu.pipeline_mode<synchronous>, transform_indices = @transform_4, window_bounds = array<i64: 1, 32>}, {pipeline_mode = #tpu.pipeline_mode<synchronous>, transform_indices = @transform_5, window_bounds = array<i64: 32, 128>}, {pipeline_mode = #tpu.pipeline_mode<synchronous>, transform_indices = @transform_6, window_bounds = array<i64: 1, 128>}, {pipeline_mode = #tpu.pipeline_mode<synchronous>, transform_indices = @transform_7, window_bounds = array<i64: 8, 8>}]} {
    %c0 = arith.constant 0 : index
    %c0_0 = arith.constant 0 : index
    %0 = vector.load %arg1[%c0, %c0_0] : memref<8x16xf32, #tpu.memory_space<vmem>>, vector<8x16xf32>
    %c0_1 = arith.constant 0 : index
    %c0_2 = arith.constant 0 : index
    %1 = vector.load %arg2[%c0_1, %c0_2] : memref<16x64xf32, #tpu.memory_space<vmem>>, vector<16x64xf32>
    %cst = arith.constant dense<0.000000e+00> : vector<8x64xf32>
    %2 = tpu.matmul %0, %1, %cst {dimension_numbers = #tpu.dot_dimension_numbers<[1], [0], [0], [1], [0, 0, 1, 1], [], []>} : vector<8x16xf32>, vector<16x64xf32>, vector<8x64xf32> -> vector<8x64xf32>
    %c0_3 = arith.constant 0 : index
    %c0_4 = arith.constant 0 : index
    %3 = vector.load %arg3[%c0_3, %c0_4] : memref<1x64xf32, #tpu.memory_space<vmem>>, vector<1x64xf32>
    %4 = vector.broadcast %3 : vector<1x64xf32> to vector<8x64xf32>
    %5 = arith.addf %2, %4 : vector<8x64xf32>
    %cst_5 = arith.constant 0.000000e+00 : f32
    %6 = vector.broadcast %cst_5 : f32 to vector<8x64xf32>
    %7 = arith.maximumf %5, %6 : vector<8x64xf32>
    %c0_6 = arith.constant 0 : index
    %c0_7 = arith.constant 0 : index
    %8 = vector.load %arg4[%c0_6, %c0_7] : memref<64x32xf32, #tpu.memory_space<vmem>>, vector<64x32xf32>
    %cst_8 = arith.constant dense<0.000000e+00> : vector<8x32xf32>
    %9 = tpu.matmul %7, %8, %cst_8 {dimension_numbers = #tpu.dot_dimension_numbers<[1], [0], [0], [1], [0, 0, 1, 1], [], []>} : vector<8x64xf32>, vector<64x32xf32>, vector<8x32xf32> -> vector<8x32xf32>
    %c0_9 = arith.constant 0 : index
    %c0_10 = arith.constant 0 : index
    %10 = vector.load %arg5[%c0_9, %c0_10] : memref<1x32xf32, #tpu.memory_space<vmem>>, vector<1x32xf32>
    %11 = vector.broadcast %10 : vector<1x32xf32> to vector<8x32xf32>
    %12 = arith.addf %9, %11 : vector<8x32xf32>
    %cst_11 = arith.constant 0.000000e+00 : f32
    %13 = vector.broadcast %cst_11 : f32 to vector<8x32xf32>
    %14 = arith.maximumf %12, %13 : vector<8x32xf32>
    %c0_12 = arith.constant 0 : index
    %c0_13 = arith.constant 0 : index
    %15 = vector.load %arg6[%c0_12, %c0_13] : memref<32x128xf32, #tpu.memory_space<vmem>>, vector<32x128xf32>
    %cst_14 = arith.constant dense<0.000000e+00> : vector<8x128xf32>
    %16 = tpu.matmul %14, %15, %cst_14 {dimension_numbers = #tpu.dot_dimension_numbers<[1], [0], [0], [1], [0, 0, 1, 1], [], []>} : vector<8x32xf32>, vector<32x128xf32>, vector<8x128xf32> -> vector<8x128xf32>
    %c0_15 = arith.constant 0 : index
    %c0_16 = arith.constant 0 : index
    %17 = vector.load %arg7[%c0_15, %c0_16] : memref<1x128xf32, #tpu.memory_space<vmem>>, vector<1x128xf32>
    %18 = vector.broadcast %17 : vector<1x128xf32> to vector<8x128xf32>
    %19 = arith.addf %16, %18 : vector<8x128xf32>
    %20 = tpu.iota {dimensions = array<i32: 1>} : vector<8x128xi32>
    %21 = tpu.iota {dimensions = array<i32: 0>} : vector<8x128xi32>
    %c6_i32 = arith.constant 6 : i32
    %22 = vector.broadcast %c6_i32 : i32 to vector<8x128xi32>
    %23 = arith.cmpi slt, %20, %22 : vector<8x128xi32>
    %c8_i32 = arith.constant 8 : i32
    %24 = vector.broadcast %c8_i32 : i32 to vector<8x128xi32>
    %25 = arith.cmpi slt, %21, %24 : vector<8x128xi32>
    %26 = arith.andi %23, %25 : vector<8x128xi1>
    %cst_17 = arith.constant 0.000000e+00 : f32
    %27 = vector.broadcast %cst_17 : f32 to vector<8x128xf32>
    %28 = arith.select %26, %19, %27 : vector<8x128xi1>, vector<8x128xf32>
    %cst_18 = arith.constant dense<0.000000e+00> : vector<128xf32>
    %29 = vector.multi_reduction <add>, %28, %cst_18 [0] : vector<8x128xf32> to vector<128xf32>
    %30 = vector.shape_cast %29 : vector<128xf32> to vector<1x128xf32>
    %cst_19 = arith.constant dense<0.000000e+00> : vector<1xf32>
    %31 = vector.multi_reduction <add>, %30, %cst_19 [1] : vector<1x128xf32> to vector<1xf32>
    %32 = vector.shape_cast %31 : vector<1xf32> to vector<1x1xf32>
    %cst_20 = arith.constant 0.020833334 : f32
    %33 = vector.broadcast %cst_20 : f32 to vector<1x1xf32>
    %34 = arith.mulf %32, %33 : vector<1x1xf32>
    %35 = vector.extract_strided_slice %19 {offsets = [0, 6], sizes = [8, 1], strides = [1, 1]} : vector<8x128xf32> to vector<8x1xf32>
    %36 = vector.extract_strided_slice %19 {offsets = [0, 0], sizes = [8, 8], strides = [1, 1]} : vector<8x128xf32> to vector<8x8xf32>
    %37 = vector.broadcast %35 : vector<8x1xf32> to vector<8x8xf32>
    %38 = arith.addf %36, %37 : vector<8x8xf32>
    %39 = vector.broadcast %34 : vector<1x1xf32> to vector<8x8xf32>
    %40 = arith.subf %38, %39 : vector<8x8xf32>
    %c0_21 = arith.constant 0 : index
    %c0_22 = arith.constant 0 : index
    %41 = vector.load %arg8[%c0_21, %c0_22] : memref<8x8xf32, #tpu.memory_space<vmem>>, vector<8x8xf32>
    tpu.vector_store %arg8[%c0_21, %c0_22], %40 {strides = array<i32>} : memref<8x8xf32, #tpu.memory_space<vmem>>, vector<8x8xf32>,
    return
  }
  func.func @transform_0(%arg0: i32) -> (i32, i32) {
    %c0_i32 = arith.constant 0 : i32
    %c0_i32_0 = arith.constant 0 : i32
    %c0_i32_1 = arith.constant 0 : i32
    return %c0_i32, %c0_i32_0 : i32, i32
  }
  func.func @transform_1(%arg0: i32) -> (i32, i32) {
    %c0_i32 = arith.constant 0 : i32
    %c0_i32_0 = arith.constant 0 : i32
    %c0_i32_1 = arith.constant 0 : i32
    return %c0_i32, %c0_i32_0 : i32, i32
  }
  func.func @transform_2(%arg0: i32) -> (i32, i32) {
    %c0_i32 = arith.constant 0 : i32
    %c0_i32_0 = arith.constant 0 : i32
    %c0_i32_1 = arith.constant 0 : i32
    return %c0_i32, %c0_i32_0 : i32, i32
  }
  func.func @transform_3(%arg0: i32) -> (i32, i32) {
    %c0_i32 = arith.constant 0 : i32
    %c0_i32_0 = arith.constant 0 : i32
    %c0_i32_1 = arith.constant 0 : i32
    return %c0_i32, %c0_i32_0 : i32, i32
  }
  func.func @transform_4(%arg0: i32) -> (i32, i32) {
    %c0_i32 = arith.constant 0 : i32
    %c0_i32_0 = arith.constant 0 : i32
    %c0_i32_1 = arith.constant 0 : i32
    return %c0_i32, %c0_i32_0 : i32, i32
  }
  func.func @transform_5(%arg0: i32) -> (i32, i32) {
    %c0_i32 = arith.constant 0 : i32
    %c0_i32_0 = arith.constant 0 : i32
    %c0_i32_1 = arith.constant 0 : i32
    return %c0_i32, %c0_i32_0 : i32, i32
  }
  func.func @transform_6(%arg0: i32) -> (i32, i32) {
    %c0_i32 = arith.constant 0 : i32
    %c0_i32_0 = arith.constant 0 : i32
    %c0_i32_1 = arith.constant 0 : i32
    return %c0_i32, %c0_i32_0 : i32, i32
  }
  func.func @transform_7(%arg0: i32) -> (i32, i32) {
    %c0_i32 = arith.constant 0 : i32
    %c0_i32_0 = arith.constant 0 : i32
    %c0_i32_1 = arith.constant 0 : i32
    return %c0_i32, %c0_i32_0 : i32, i32
  }
}

</mosaic_0001>

<bundles_post_ra>
// kernel: tpu_custom_call.1
= control target key start
LH: loop header
LB: loop body
LE: loop exit
PB: predicated region body
PF: predicated region fallthrough
CT: control target
= control target key end

     0   :  { %v438_v2 = vmov 0.0|0.0   ;;  %vm439_vm0 = vmmov 0   ;;  %v440_v4 = vmov 0.0   ;;  %vm37_vm1 = vcmask 130048   ;;  %s552_s0 = inlined_call_operand.vmem [shape: f32[8,16], index: 0, kind: input, shape index: {}]   ;;  %s553_s1 = inlined_call_operand.vmem [shape: f32[16,64], index: 1, kind: input, shape index: {}]   ;;  %s554_s2 = inlined_call_operand.vmem [shape: f32[1,64], index: 2, kind: input, shape index: {}]   ;;  %s555_s3 = inlined_call_operand.vmem [shape: f32[64,32], index: 3, kind: input, shape index: {}]   ;;  %s556_s4 = inlined_call_operand.vmem [shape: f32[1,32], index: 4, kind: input, shape index: {}]   ;;  %s557_s5 = inlined_call_operand.vmem [shape: f32[32,128], index: 5, kind: input, shape index: {}]   ;;  %s558_s6 = inlined_call_operand.vmem [shape: f32[1,128], index: 6, kind: input, shape index: {}]   ;;  %s559_s7 = inlined_call_operand.hbm [shape: f32[8,8], index: 7, kind: output, shape index: {}]  }
   0x1   :  { %v28_v0 = vld [vmem:[%s553_s1] sm:$0xff]  ;;  %v29_v1 = vld [vmem:[%s553_s1 + $0x8] sm:$0xff]  ;;  %387 = vmatprep.subr.bf16.mxu0 %v438_v2  ;;  %354 = vmatprep.mubr.msk.f32.mxu0 %vm439_vm0, %v440_v4  ;;  %v114_v7 = vld [vmem:[%s555_s3 + $0x10] sm:$0xff] }
   0x2   :  { %v388_v3 = vpack.c.bf16 %v29_v1, %v28_v0  ;;  %v112_v5 = vld [vmem:[%s555_s3] sm:$0xff]  ;;  %v113_v6 = vld [vmem:[%s555_s3 + $0x8] sm:$0xff]  ;;  %390 = vmatprep.subr.bf16.mxu1 %v438_v2  ;;  %v115_v9 = vld [vmem:[%s555_s3 + $0x18] sm:$0xff]  ;;  %373 = vmatprep.mubr.msk.f32.mxu1 %vm439_vm0, %v440_v4 }
   0x3   :  { %v391_v8 = vpack.c.bf16 %v113_v6, %v112_v5  ;;  %v27_v10 = vld [vmem:[%s552_s0] sm:$0xff] }
   0x4   :  { %389 = vmatpush3.bf16.msra.mxu0 %v388_v3 }
   0x5   :  { %12 = vsyncpa [#allocation3], 0  ;;  %392 = vmatpush3.bf16.msra.mxu1 %v391_v8  ;;  %v394_v11 = vpack.c.bf16 %v115_v9, %v114_v7  ;;  %402 = vmatprep.subr.bf16.mxu0 %v438_v2  ;;  %v116_v12 = vld [vmem:[%s555_s3 + $0x20] sm:$0xff]  ;;  %v117_v13 = vld [vmem:[%s555_s3 + $0x28] sm:$0xff]  ;;  %vm127_vm2 = vcmask 523264   ;;  %vm213_vm3 = vcmask 261120   ;;  %v287_v35 = vlaneseq }
   0x6   :  { %393 = vmatprep.subr.bf16.mxu1 %v438_v2  ;;  %v397_v14 = vpack.c.bf16 %v117_v13, %v116_v12  ;;  %v118_v15 = vld [vmem:[%s555_s3 + $0x30] sm:$0xff]  ;;  %v119_v16 = vld [vmem:[%s555_s3 + $0x38] sm:$0xff]  ;;  %v202_v18 = vld [vmem:[%s557_s5] sm:$0xff]  ;;  %v441_v34 = vmov 6   ;;  %vm311_vm5 = vcmask 64512  }
   0x7   :  { %355 = vmatmul.mubr.msk.f32.vlgmr.msra.gmra.mrb[0].mxu0 %vm37_vm1, %v27_v10  ;;  %v400_v17 = vpack.c.bf16 %v119_v16, %v118_v15  ;;  %v203_v19 = vld [vmem:[%s557_s5 + $0x8] sm:$0xff]  ;;  %v327_v21 = vld [vmem:[%s554_s2] ss:$0 sm:$0xff]  ;;  %v204_v26 = vld [vmem:[%s557_s5 + $0x10] sm:$0xff]  ;;  %413 = vset.pattern.permute.xlu0 %v441_v34  ;;  %v288_v36 = vand.u32 127, %v287_v35 }
   0x8   :  { %384 = vmatprep.mubr.msk.f32.mxu0 %vm439_vm0, %v440_v4  ;;  %v403_v20 = vpack.c.bf16 %v203_v19, %v202_v18  ;;  %v205_v27 = vld [vmem:[%s557_s5 + $0x18] sm:$0xff]  ;;  %v329_v29 = vld [vmem:[%s556_s4] ss:$0 sm:$0xff]  ;;  %s442_s4 = smov [#allocation2]  }
   0x9   :  { %395 = vmatpush3.bf16.msra.mxu1 %v394_v11  ;;  %v406_v28 = vpack.c.bf16 %v205_v27, %v204_v26  ;;  %v331_v37 = vld [vmem:[%s558_s6] ss:$0 sm:$0xff]  ;;  %vm291_vm4 = vcmp.lt.s32.totalorder %v288_v36, 6  ;;  %s319_s5 = sshll.u32 %s442_s4, 4  ;;  %s320_s5 = int_to_ptr.vmem [resolvable:$true] %s319_s5 }
   0xa   :  { %396 = vmatprep.subr.bf16.mxu1 %v438_v2  ;;  %404 = vmatpush3.bf16.msra.mxu0 %v403_v20  ;;  %s414_s6 = scalar_lea.vmem %s320_s5, 128  ;;  %p419_p1 = scmp.lt.s32.totalorder %s320_s5, %s320_s5 }
   0xb   :  { %405 = vmatprep.subr.bf16.mxu0 %v438_v2  ;;  %p415_p0 = scmp.ne.s32.totalorder %s320_s5, %s414_s6  ;;  %p420_p2 = scmp.lt.s32.totalorder %s414_s6, %s414_s6 }
   0xd   :  { %398 = vmatpush3.bf16.msra.mxu1 %v397_v14  ;;  %p421_p3 = por %p420_p2, %p419_p1 }
   0xe   :  { %399 = vmatprep.subr.bf16.mxu1 %v438_v2  ;;  %407 = vmatpush3.bf16.msra.mxu0 %v406_v28 }
   0xf   :  { %p422_p4 = pnand %p421_p3, %p415_p0 }
  0x11   :  { %401 = vmatpush3.bf16.msra.mxu1 %v400_v17 }
  0xda   :  { %v107_v22 = vpop.f32.mrb[0].mxu0 }
  0xdb   :  { %v108_v23 = vadd.f32 %v327_v21, %v107_v22  ;;  %v356_v24 = vpop.f32.mrb[1].mxu0 }
  0xdd   :  { %v111_v25 = vmax.f32 %v108_v23, 0.0 }
  0xdf   :  { %374 = vmatmul.mubr.msk.f32.vlgmr.msra.gmra.mrb[0].mxu1 %vm127_vm2, %v111_v25 }
 0x1b2   :  { %v197_v30 = vpop.f32.mrb[0].mxu1 }
 0x1b3   :  { %v198_v31 = vadd.f32 %v329_v29, %v197_v30  ;;  %v375_v32 = vpop.f32.mrb[1].mxu1 }
 0x1b5   :  { %v201_v33 = vmax.f32 %v198_v31, 0.0 }
 0x1b7   :  { %385 = vmatmul.mubr.msk.f32.vlgmr.msra.gmra.mrb[2].mxu0 %vm213_vm3, %v201_v33 }
 0x28a   :  { %v283_v38 = vpop.f32.mrb[2].mxu0 }
 0x28b   :  { %v284_v39 = vadd.f32 %v331_v37, %v283_v38  ;;  %v386_v40 = vpop.f32.mrb[3].mxu0 }
 0x28d   :  { %v294_v41 = vsel %vm291_vm4, %v284_v39, 0.0 }
 0x28e   :  { %v295_v42 = vrot.slane %v294_v41, 4 }
 0x290   :  { %v296_v43 = vadd.f32 %v295_v42, %v294_v41 }
 0x292   :  { %v297_v44 = vrot.slane %v296_v43, 2 }
 0x294   :  { %v298_v45 = vadd.f32 %v297_v44, %v296_v43 }
 0x296   :  { %v299_v46 = vrot.slane %v298_v45, 1 }
 0x298   :  { %v300_v47 = vadd.f32 %v299_v46, %v298_v45 }
 0x29a   :  { %301 = vadd.xlane.f32.xlu0 %v300_v47 }
 0x2b0   :  { %306 = vperm.xlu0 %413, %v284_v39  }
 0x327   :  { %v302_v48 = vpop.xlane.xlu0 %301 }
 0x328   :  { %v303_v50 = vmul.f32 0.020833334, %v302_v48 }
 0x32f   :  { %v307_v49 = vpop.permute.xlu0 %306 }
 0x330   :  { %v309_v51 = vadd.f32 %v307_v49, %v284_v39 }
 0x332   :  { %v310_v52 = vsub.f32 %v309_v51, %v303_v50 }
 0x334   :  { %312 = vst.msk [vmem:[#allocation2] sm:$0xff] %vm311_vm5, %v310_v52 }
 0x335   :  { %425 = shalt.err (!%p422_p4)
}
 0x336   :  { %s426_s11 = scalar_lea.hbm %s559_s7, 128 }
 0x337   :  { %p427_p5 = scmp.ne.s32.totalorder %s559_s7, %s426_s11  ;;  %p430_p6 = scmp.lt.u32.totalorder %s426_s11, %s559_s7 }
 0x339   :  { %p432_p7 = pnand %p430_p6, %p427_p5 }
 0x33b   :  { %435 = shalt.err (!%p432_p7)
}
 0x33c   :  { %322 = dma.vmem_to_hbm [thread:$0]  %s320_s5, 128, %s559_s7, [#allocation3]  }
 0x33d   :  { %436 = dma.done.wait [#allocation3], 128  }
 0x33e   :  { %437 = vsyncadd [#allocation3], 4294967168 }
 0x33f   :  { %326 = vsyncpa [#allocation3], 1 }

</bundles_post_ra>
